<compile_context>
chip_gen: v7x
topology: tpu7x:2x2x1
jax: 0.10.0
libtpu: 0.0.40
codegen_flags: <defaults>
</compile_context>

<pallas_src>
import jax
import jax.numpy as jnp
from jax.experimental import pallas as pl
from jax.experimental.pallas import tpu as pltpu

_NT_DIMS = (((1,), (1,)), ((), ()))  # contract last dims of both operands


def _round_up(x, m):
    return ((x + m - 1) // m) * m


def qnet_kernel(x_ref, w1_ref, b1_ref, w2_ref, b2_ref, w3_ref, b3_ref, o_ref):
    # Layer 1: single MXU matmul over the merged K = state_dim + action_dim.
    h1 = jnp.dot(x_ref[...], w1_ref[...],
                 preferred_element_type=jnp.float32) + b1_ref[...]
    h1 = jnp.maximum(h1, 0.0)

    # Layer 2: cast activations back to the weight dtype for native MXU rate,
    # accumulate in f32.
    h2 = jnp.dot(h1.astype(w2_ref.dtype), w2_ref[...],
                 preferred_element_type=jnp.float32) + b2_ref[...]
    h2 = jnp.maximum(h2, 0.0)

    # Head (N=1): NT matmul w3_pad(8,H) x h2(TB,H)^T -> (8, TB) so the result
    # is a lane-dense row block (row 0 real, rows 1..7 junk from zero padding).
    q8 = jax.lax.dot_general(w3_ref[...], h2, _NT_DIMS,
                             preferred_element_type=jnp.float32)
    q8 = q8 + b3_ref[0]                       # scalar bias from SMEM
    o_ref[...] = q8.astype(o_ref.dtype)


def init_params(key, state_dim, action_dim, hidden=256):
    """Deterministic init mimicking nn.Linear (uniform +/- 1/sqrt(fan_in))."""
    in_dim = state_dim + action_dim
    keys = jax.random.split(key, 6)

    def lin(kw, kb, fan_in, fan_out):
        bound = 1.0 / jnp.sqrt(fan_in)
        w = jax.random.uniform(kw, (fan_in, fan_out), jnp.float32, -bound, bound)
        b = jax.random.uniform(kb, (1, fan_out), jnp.float32, -bound, bound)
        return w, b

    w1, b1 = lin(keys[0], keys[1], in_dim, hidden)
    w2, b2 = lin(keys[2], keys[3], hidden, hidden)
    w3, b3 = lin(keys[4], keys[5], hidden, 1)
    return (w1, b1, w2, b2, w3, b3)


def prepare_params(params, compute_dtype=jnp.bfloat16):
    """One-time re-layout for the kernel: cast weights, pad w3, scalar-ify b3."""
    w1, b1, w2, b2, w3, b3 = params
    w1c = w1.astype(compute_dtype)                       # (in_dim, H)
    w2c = w2.astype(compute_dtype)                       # (H, H)
    b1c = b1.astype(jnp.float32)                         # (1, H)
    b2c = b2.astype(jnp.float32)                         # (1, H)
    # Head weight padded to 8 MXU rows (row 0 real) for the lane-dense store.
    w3row = w3.reshape(1, -1).astype(jnp.float32)        # (1, H)
    w3pad = jnp.concatenate(
        [w3row, jnp.zeros((7, w3row.shape[1]), jnp.float32)], axis=0)  # (8, H)
    b3c = b3.reshape(-1).astype(jnp.float32)             # (1,) scalar in SMEM
    return (w1c, b1c, w2c, b2c, w3pad, b3c)


def qnetwork_forward(state, action, prep):
    """state: (B, state_dim), action: (B, action_dim) -> (B, 1) f32."""
    w1, b1, w2, b2, w3pad, b3 = prep
    compute_dtype = w1.dtype
    B = state.shape[0]
    in_dim = w1.shape[0]
    H = w2.shape[0]

    # Pack [state || action] once (tiny, ~KBs) so layer 1 is a single matmul.
    x = jnp.concatenate([state, action], axis=1).astype(compute_dtype)

    # Batch tile: biggest reasonable tile (VMEM footprint is <2 MiB even at
    # TB=512); if that leaves a 1-step grid, halve it so "parallel" can put
    # one tile on each v7x TensorCore.
    TB = min(512, _round_up(B, 8))
    padded_B = _round_up(B, TB)
    if padded_B // TB == 1 and TB >= 16:
        TB = _round_up(TB // 2, 8)
        padded_B = _round_up(B, TB)
    if padded_B != B:
        x = jnp.pad(x, ((0, padded_B - B), (0, 0)))
    num_tiles = padded_B // TB
    grid = (num_tiles,)

    itemsize = jnp.dtype(compute_dtype).itemsize
    flops = 2 * padded_B * (in_dim * H + H * H) + 2 * 8 * padded_B * H
    bytes_accessed = (
        padded_B * in_dim * itemsize
        + (w1.size + w2.size) * itemsize
        + (b1.size + b2.size + w3pad.size + b3.size) * 4
        + num_tiles * 8 * TB * 4
    )

    out = pl.pallas_call(
        qnet_kernel,
        out_shape=jax.ShapeDtypeStruct((num_tiles * 8, TB), jnp.float32),
        grid=grid,
        in_specs=[
            pl.BlockSpec((TB, in_dim), lambda i: (i, 0)),    # packed [s||a] tile
            pl.BlockSpec((in_dim, H), lambda i: (0, 0)),     # w1 (VMEM-resident)
            pl.BlockSpec((1, H), lambda i: (0, 0)),          # b1
            pl.BlockSpec((H, H), lambda i: (0, 0)),          # w2 (VMEM-resident)
            pl.BlockSpec((1, H), lambda i: (0, 0)),          # b2
            pl.BlockSpec((8, H), lambda i: (0, 0)),          # w3 padded to 8 rows
            pl.BlockSpec((1,), lambda i: (0,),               # b3 scalar in SMEM
                         memory_space=pltpu.MemorySpace.SMEM),
        ],
        out_specs=pl.BlockSpec((8, TB), lambda i: (i, 0)),   # lane-dense rows
        compiler_params=pltpu.CompilerParams(
            dimension_semantics=("parallel",)),
        cost_estimate=pl.CostEstimate(
            flops=flops, transcendentals=0, bytes_accessed=bytes_accessed),
    )(x, w1, b1, w2, b2, w3pad, b3)

    # Row 0 of each (8, TB) block holds the real Q values; rows 1..7 are junk.
    q = out.reshape(num_tiles, 8, TB)[:, 0, :].reshape(padded_B, 1)
    return q[:B]


def qnetwork_ref(state, action, params):
    """Pure-JAX f32 reference for correctness checking."""
    x = jnp.concatenate([state, action], axis=1).astype(jnp.float32)
    w1, b1, w2, b2, w3, b3 = params
    h1 = jnp.maximum(x @ w1 + b1, 0.0)
    h2 = jnp.maximum(h1 @ w2 + b2, 0.0)
    return h2 @ w3 + b3


if __name__ == "__main__":
    key = jax.random.PRNGKey(0)
    k_state, k_action, k_params = jax.random.split(key, 3)

    batch, state_dim, action_dim = 2, 8, 4
    state = jax.random.normal(k_state, (batch, state_dim), jnp.float32)
    action = jax.random.normal(k_action, (batch, action_dim), jnp.float32)
    params = init_params(k_params, state_dim, action_dim)
    ref = qnetwork_ref(state, action, params)

    # Exact-semantics path (f32 compute): tight tolerance.
    prep_f32 = prepare_params(params, compute_dtype=jnp.float32)
    out_f32 = jax.block_until_ready(qnetwork_forward(state, action, prep_f32))
    assert out_f32.shape == (batch, 1)
    assert jnp.allclose(out_f32, ref, atol=1e-4, rtol=1e-4)

    # Performance path (bf16 weights/activations, f32 accumulation).
    prep_bf16 = prepare_params(params, compute_dtype=jnp.bfloat16)
    out_bf16 = jax.block_until_ready(qnetwork_forward(state, action, prep_bf16))
    assert out_bf16.shape == (batch, 1)
    assert jnp.allclose(out_bf16, ref, atol=5e-2, rtol=5e-2)

    # Multi-tile grid path (exercises batch tiling + the 2-step v7x split).
    B2 = 300
    k_s2, k_a2 = jax.random.split(jax.random.PRNGKey(1))
    state2 = jax.random.normal(k_s2, (B2, state_dim), jnp.float32)
    action2 = jax.random.normal(k_a2, (B2, action_dim), jnp.float32)
    ref2 = qnetwork_ref(state2, action2, params)
    out2 = jax.block_until_ready(qnetwork_forward(state2, action2, prep_bf16))
    assert out2.shape == (B2, 1)
    assert jnp.allclose(out2, ref2, atol=1e-1, rtol=1e-1)

    print("KERNEL_OK")
</pallas_src>

<mosaic_0001>
module attributes {stable_mosaic.version = 11 : i64} {
  func.func @qnet_kernel(%arg0: i32, %arg1: memref<8x12xf32, #tpu.memory_space<vmem>>, %arg2: memref<12x256xf32, #tpu.memory_space<vmem>>, %arg3: memref<1x256xf32, #tpu.memory_space<vmem>>, %arg4: memref<256x256xf32, #tpu.memory_space<vmem>>, %arg5: memref<1x256xf32, #tpu.memory_space<vmem>>, %arg6: memref<8x256xf32, #tpu.memory_space<vmem>>, %arg7: memref<1xf32, #tpu.memory_space<smem>>, %arg8: memref<8x8xf32, #tpu.memory_space<vmem>>) attributes {dimension_semantics = [#tpu.dimension_semantics<parallel>], iteration_bounds = array<i64: 1>, scalar_prefetch = 0 : i64, scratch_operands = 0 : i64, tpu.core_type = #tpu.core_type<tc>, window_params = [{transform_indices = @transform_0, window_bounds = array<i64: 8, 12>}, {pipeline_mode = #tpu.pipeline_mode<synchronous>, transform_indices = @transform_1, window_bounds = array<i64: 12, 256>}, {pipeline_mode = #tpu.pipeline_mode<synchronous>, transform_indices = @transform_2, window_bounds = array<i64: 1, 256>}, {pipeline_mode = #tpu.pipeline_mode<synchronous>, transform_indices = @transform_3, window_bounds = array<i64: 256, 256>}, {pipeline_mode = #tpu.pipeline_mode<synchronous>, transform_indices = @transform_4, window_bounds = array<i64: 1, 256>}, {pipeline_mode = #tpu.pipeline_mode<synchronous>, transform_indices = @transform_5, window_bounds = array<i64: 8, 256>}, {transform_indices = @transform_6, window_bounds = array<i64: 1>}, {transform_indices = @transform_7, window_bounds = array<i64: 8, 8>}]} {
    %c0 = arith.constant 0 : index
    %c0_0 = arith.constant 0 : index
    %0 = vector.load %arg1[%c0, %c0_0] : memref<8x12xf32, #tpu.memory_space<vmem>>, vector<8x12xf32>
    %c0_1 = arith.constant 0 : index
    %c0_2 = arith.constant 0 : index
    %1 = vector.load %arg2[%c0_1, %c0_2] : memref<12x256xf32, #tpu.memory_space<vmem>>, vector<12x256xf32>
    %cst = arith.constant dense<0.000000e+00> : vector<8x256xf32>
    %2 = tpu.matmul %0, %1, %cst {dimension_numbers = #tpu.dot_dimension_numbers<[1], [0], [0], [1], [0, 0, 1, 1], [], []>} : vector<8x12xf32>, vector<12x256xf32>, vector<8x256xf32> -> vector<8x256xf32>
    %c0_3 = arith.constant 0 : index
    %c0_4 = arith.constant 0 : index
    %3 = vector.load %arg3[%c0_3, %c0_4] : memref<1x256xf32, #tpu.memory_space<vmem>>, vector<1x256xf32>
    %4 = vector.broadcast %3 : vector<1x256xf32> to vector<8x256xf32>
    %5 = arith.addf %2, %4 : vector<8x256xf32>
    %cst_5 = arith.constant 0.000000e+00 : f32
    %6 = vector.broadcast %cst_5 : f32 to vector<8x256xf32>
    %7 = arith.maximumf %5, %6 : vector<8x256xf32>
    %c0_6 = arith.constant 0 : index
    %c0_7 = arith.constant 0 : index
    %8 = vector.load %arg4[%c0_6, %c0_7] : memref<256x256xf32, #tpu.memory_space<vmem>>, vector<256x256xf32>
    %cst_8 = arith.constant dense<0.000000e+00> : vector<8x256xf32>
    %9 = tpu.matmul %7, %8, %cst_8 {dimension_numbers = #tpu.dot_dimension_numbers<[1], [0], [0], [1], [0, 0, 1, 1], [], []>} : vector<8x256xf32>, vector<256x256xf32>, vector<8x256xf32> -> vector<8x256xf32>
    %c0_9 = arith.constant 0 : index
    %c0_10 = arith.constant 0 : index
    %10 = vector.load %arg5[%c0_9, %c0_10] : memref<1x256xf32, #tpu.memory_space<vmem>>, vector<1x256xf32>
    %11 = vector.broadcast %10 : vector<1x256xf32> to vector<8x256xf32>
    %12 = arith.addf %9, %11 : vector<8x256xf32>
    %cst_11 = arith.constant 0.000000e+00 : f32
    %13 = vector.broadcast %cst_11 : f32 to vector<8x256xf32>
    %14 = arith.maximumf %12, %13 : vector<8x256xf32>
    %c0_12 = arith.constant 0 : index
    %c0_13 = arith.constant 0 : index
    %15 = vector.load %arg6[%c0_12, %c0_13] : memref<8x256xf32, #tpu.memory_space<vmem>>, vector<8x256xf32>
    %cst_14 = arith.constant dense<0.000000e+00> : vector<8x8xf32>
    %16 = tpu.matmul %15, %14, %cst_14 {dimension_numbers = #tpu.dot_dimension_numbers<[1], [1], [0], [0], [0, 0, 1, 0], [], []>} : vector<8x256xf32>, vector<8x256xf32>, vector<8x8xf32> -> vector<8x8xf32>
    %c0_15 = arith.constant 0 : index
    %17 = memref.load %arg7[%c0_15] : memref<1xf32, #tpu.memory_space<smem>>
    %18 = vector.broadcast %17 : f32 to vector<8x8xf32>
    %19 = arith.addf %16, %18 : vector<8x8xf32>
    %c0_16 = arith.constant 0 : index
    %c0_17 = arith.constant 0 : index
    %20 = vector.load %arg8[%c0_16, %c0_17] : memref<8x8xf32, #tpu.memory_space<vmem>>, vector<8x8xf32>
    tpu.vector_store %arg8[%c0_16, %c0_17], %19 {strides = array<i32>} : memref<8x8xf32, #tpu.memory_space<vmem>>, vector<8x8xf32>,
    return
  }
  func.func @transform_0(%arg0: i32) -> (i32, i32) {
    %c0_i32 = arith.constant 0 : i32
    %c0_i32_0 = arith.constant 0 : i32
    return %arg0, %c0_i32 : i32, i32
  }
  func.func @transform_1(%arg0: i32) -> (i32, i32) {
    %c0_i32 = arith.constant 0 : i32
    %c0_i32_0 = arith.constant 0 : i32
    %c0_i32_1 = arith.constant 0 : i32
    return %c0_i32, %c0_i32_0 : i32, i32
  }
  func.func @transform_2(%arg0: i32) -> (i32, i32) {
    %c0_i32 = arith.constant 0 : i32
    %c0_i32_0 = arith.constant 0 : i32
    %c0_i32_1 = arith.constant 0 : i32
    return %c0_i32, %c0_i32_0 : i32, i32
  }
  func.func @transform_3(%arg0: i32) -> (i32, i32) {
    %c0_i32 = arith.constant 0 : i32
    %c0_i32_0 = arith.constant 0 : i32
    %c0_i32_1 = arith.constant 0 : i32
    return %c0_i32, %c0_i32_0 : i32, i32
  }
  func.func @transform_4(%arg0: i32) -> (i32, i32) {
    %c0_i32 = arith.constant 0 : i32
    %c0_i32_0 = arith.constant 0 : i32
    %c0_i32_1 = arith.constant 0 : i32
    return %c0_i32, %c0_i32_0 : i32, i32
  }
  func.func @transform_5(%arg0: i32) -> (i32, i32) {
    %c0_i32 = arith.constant 0 : i32
    %c0_i32_0 = arith.constant 0 : i32
    %c0_i32_1 = arith.constant 0 : i32
    return %c0_i32, %c0_i32_0 : i32, i32
  }
  func.func @transform_6(%arg0: i32) -> i32 {
    %c0_i32 = arith.constant 0 : i32
    %c0_i32_0 = arith.constant 0 : i32
    return %c0_i32 : i32
  }
  func.func @transform_7(%arg0: i32) -> (i32, i32) {
    %c0_i32 = arith.constant 0 : i32
    %c0_i32_0 = arith.constant 0 : i32
    return %arg0, %c0_i32 : i32, i32
  }
}

</mosaic_0001>

<bundles_post_ra>
// kernel: tpu_custom_call.1
= control target key start
LH: loop header
LB: loop body
LE: loop exit
PB: predicated region body
PF: predicated region fallthrough
CT: control target
= control target key end

     0   :  { %13 = vsyncpa [#allocation4], 0  ;;  %s709_s0 = inlined_call_operand.hbm [shape: f32[8,12], index: 0, kind: input, shape index: {}]   ;;  %s710_s1 = inlined_call_operand.hbm [shape: f32[12,256], index: 1, kind: input, shape index: {}]   ;;  %s711_s2 = inlined_call_operand.vmem [shape: f32[1,256], index: 2, kind: input, shape index: {}]   ;;  %s712_s3 = inlined_call_operand.hbm [shape: f32[256,256], index: 3, kind: input, shape index: {}]   ;;  %s713_s4 = inlined_call_operand.vmem [shape: f32[1,256], index: 4, kind: input, shape index: {}]   ;;  %s714_s5 = inlined_call_operand.vmem [shape: f32[8,256], index: 5, kind: input, shape index: {}]   ;;  %s715_s6 = inlined_call_operand.<no memory space> [shape: f32[1], index: 6, kind: input, shape index: {}]   ;;  %s716_s7 = inlined_call_operand.hbm [shape: f32[8,8], index: 7, kind: output, shape index: {}]  }
   0x1   :  { %14 = vsyncpa [#allocation7], 0 }
   0x2   :  { %15 = vsyncpa [#allocation5], 0  ;;  %s584_s24 = smov [#allocation6]   ;;  %s490_s28 = scalar_lea.hbm %s710_s1, 512 }
   0x3   :  { %s31_s25 = sshll.u32 %s584_s24, 4  ;;  %p491_p0 = scmp.ne.s32.totalorder %s710_s1, %s490_s28  ;;  %s32_s25 = int_to_ptr.vmem [resolvable:$true] %s31_s25 }
   0x4   :  { %p494_p1 = scmp.lt.u32.totalorder %s490_s28, %s710_s1 }
   0x6   :  { %p496_p2 = pnand %p494_p1, %p491_p0 }
   0x8   :  { %499 = shalt.err (!%p496_p2)
}
   0x9   :  { %s500_s10 = scalar_lea.vmem %s32_s25, 512  ;;  %p505_p4 = scmp.lt.s32.totalorder %s32_s25, %s32_s25 }
   0xa   :  { %p501_p3 = scmp.ne.s32.totalorder %s32_s25, %s500_s10  ;;  %p506_p5 = scmp.lt.s32.totalorder %s500_s10, %s500_s10 }
   0xc   :  { %p507_p6 = por %p506_p5, %p505_p4 }
   0xe   :  { %p508_p7 = pnand %p507_p6, %p501_p3 }
  0x10   :  { %511 = shalt.err (!%p508_p7)
}
  0x11   :  { %s585_s11 = smov 256   ;;  %s586_s12 = smov 16  }
  0x12   :  { %37 = dma.hbm_to_vmem [thread:$0]  %s710_s1, 512, %s32_s25, [#allocation7], %s585_s11, %s585_s11, %s586_s12  }
  0x13   :  { %s587_s15 = smov [#allocation3]   ;;  %s588_s17 = smov [#allocation8]  }
  0x14   :  { %s22_s16 = sshll.u32 %s587_s15, 4  ;;  %s45_s18 = sshll.u32 %s588_s17, 4  ;;  %s23_s16 = int_to_ptr.vmem [resolvable:$true] %s22_s16  ;;  %s46_s18 = int_to_ptr.vmem [resolvable:$true] %s45_s18 }
  0x15   :  { %s512_s21 = scalar_lea.hbm %s709_s0, 128 }
  0x16   :  { %p513_p8 = scmp.ne.s32.totalorder %s709_s0, %s512_s21  ;;  %p516_p9 = scmp.lt.u32.totalorder %s512_s21, %s709_s0 }
  0x18   :  { %p518_p10 = pnand %p516_p9, %p513_p8 }
  0x1a   :  { %521 = shalt.err (!%p518_p10)
}
  0x1b   :  { %s522_s1 = scalar_lea.vmem %s23_s16, 128  ;;  %p527_p12 = scmp.lt.s32.totalorder %s23_s16, %s23_s16 }
  0x1c   :  { %p523_p11 = scmp.ne.s32.totalorder %s23_s16, %s522_s1  ;;  %p528_p13 = scmp.lt.s32.totalorder %s522_s1, %s522_s1 }
  0x1e   :  { %p529_p0 = por %p528_p13, %p527_p12 }
  0x20   :  { %p530_p1 = pnand %p529_p0, %p523_p11 }
  0x22   :  { %533 = shalt.err (!%p530_p1)
}
  0x23   :  { %25 = dma.hbm_to_vmem [thread:$0]  %s709_s0, 128, %s23_s16, [#allocation4]  }
  0x24   :  { %s534_s30 = scalar_lea.hbm %s712_s3, 8192 }
  0x25   :  { %p535_p2 = scmp.ne.s32.totalorder %s712_s3, %s534_s30  ;;  %p538_p3 = scmp.lt.u32.totalorder %s534_s30, %s712_s3 }
  0x27   :  { %p540_p4 = pnand %p538_p3, %p535_p2 }
  0x29   :  { %543 = shalt.err (!%p540_p4)
}
  0x2a   :  { %s544_s14 = scalar_lea.vmem %s46_s18, 8192  ;;  %p549_p6 = scmp.lt.s32.totalorder %s46_s18, %s46_s18 }
  0x2b   :  { %p545_p5 = scmp.ne.s32.totalorder %s46_s18, %s544_s14  ;;  %p550_p7 = scmp.lt.s32.totalorder %s544_s14, %s544_s14 }
  0x2d   :  { %p551_p8 = por %p550_p7, %p549_p6 }
  0x2f   :  { %p552_p9 = pnand %p551_p8, %p545_p5 }
  0x31   :  { %555 = shalt.err (!%p552_p9)
}
  0x32   :  { %51 = dma.hbm_to_vmem [thread:$0]  %s712_s3, 8192, %s46_s18, [#allocation7], %s585_s11, %s585_s11, %s586_s12  }
  0x33   :  { %578 = dma.done.wait [#allocation4], 128  }
  0x34   :  { %579 = vsyncadd [#allocation4], 4294967168 }
  0x35   :  { %580 = dma.done.wait [#allocation7], 8704  }
  0x36   :  { %581 = vsyncadd [#allocation7], 4294958592  ;;  %v589_v0 = vmov 0.0   ;;  %vm88_vm0 = vcmask 1043456   ;;  %vm590_vm1 = vmmov 1   ;;  %v69_v2 = vld [vmem:[#allocation6 + $0x8] sm:$0xff] }
  0x37   :  { %159 = vmatprep.mubr.f32.mxu0 %v589_v0  ;;  %vm674_vm2 = vmpackc.low %vm88_vm0, %vm590_vm1  ;;  %v71_v3 = vld [vmem:[#allocation6 + $0x18] sm:$0xf]  ;;  %v68_v4 = vld [vmem:[#allocation6] sm:$0xff]  ;;  %vm84_vm3 = vcmask 97280   ;;  %vm391_vm4 = vcmask 64512  }
  0x38   :  { %v412_v5 = vpack.c.bf16 %v71_v3, %v69_v2  ;;  %v70_v6 = vld [vmem:[#allocation6 + $0x10] sm:$0xf]  ;;  %v169_v7 = vld [vmem:[#allocation8 + $0x8] sm:$0xff]  ;;  %v67_v9 = vld [vmem:[#allocation3] sm:$0xff] }
  0x39   :  { %v415_v8 = vpack.c.bf16 %v70_v6, %v68_v4  ;;  %v171_v10 = vld [vmem:[#allocation8 + $0x18] sm:$0xff]  ;;  %v168_v11 = vld [vmem:[#allocation8] sm:$0xff]  ;;  %v170_v12 = vld [vmem:[#allocation8 + $0x10] sm:$0xff] }
  0x3a   :  { %414 = vmatprep.subr.msk.bf16.mxu0 %vm674_vm2, %v412_v5  ;;  %v418_v13 = vpack.c.bf16 %v171_v10, %v169_v7  ;;  %v420_v14 = vpack.c.bf16 %v170_v12, %v168_v11  ;;  %v173_v15 = vld [vmem:[#allocation8 + $0x28] sm:$0xff]  ;;  %v175_v16 = vld [vmem:[#allocation8 + $0x38] sm:$0xff]  ;;  %v172_v17 = vld [vmem:[#allocation8 + $0x20] sm:$0xff] }
  0x3b   :  { %417 = vmatpush1.bf16.msk.msra.mxu0 %vm674_vm2, %v415_v8  ;;  %v422_v18 = vpack.c.bf16 %v175_v16, %v173_v15  ;;  %v174_v19 = vld [vmem:[#allocation8 + $0x30] sm:$0xff]  ;;  %v177_v20 = vld [vmem:[#allocation8 + $0x48] sm:$0xff]  ;;  %v179_v21 = vld [vmem:[#allocation8 + $0x58] sm:$0xff] }
  0x3c   :  { %419 = vmatprep.subr.bf16.mxu1 %v418_v13  ;;  %v424_v22 = vpack.c.bf16 %v174_v19, %v172_v17  ;;  %v426_v23 = vpack.c.bf16 %v179_v21, %v177_v20  ;;  %v176_v24 = vld [vmem:[#allocation8 + $0x40] sm:$0xff]  ;;  %v178_v25 = vld [vmem:[#allocation8 + $0x50] sm:$0xff]  ;;  %v181_v26 = vld [vmem:[#allocation8 + $0x68] sm:$0xff] }
  0x3d   :  { %421 = vmatpush1.bf16.msra.mxu1 %v420_v14  ;;  %v183_v27 = vld [vmem:[#allocation8 + $0x78] sm:$0xff]  ;;  %v428_v28 = vpack.c.bf16 %v178_v25, %v176_v24  ;;  %v180_v30 = vld [vmem:[#allocation8 + $0x60] sm:$0xff]  ;;  %v182_v31 = vld [vmem:[#allocation8 + $0x70] sm:$0xff] }
  0x3e   :  { %411 = vmatmul.mubr.msk.f32.vlgmr.msra.gmra.mrb[0].mxu0 %vm84_vm3, %v67_v9  ;;  %423 = vmatprep.subr.bf16.mxu1 %v422_v18  ;;  %v430_v29 = vpack.c.bf16 %v183_v27, %v181_v26  ;;  %v185_v32 = vld [vmem:[#allocation8 + $0x88] sm:$0xff]  ;;  %v187_v33 = vld [vmem:[#allocation8 + $0x98] sm:$0xff]  ;;  %v432_v34 = vpack.c.bf16 %v182_v31, %v180_v30  ;;  %v184_v36 = vld [vmem:[#allocation8 + $0x80] sm:$0xff] }
  0x3f   :  { %v434_v35 = vpack.c.bf16 %v187_v33, %v185_v32  ;;  %v186_v37 = vld [vmem:[#allocation8 + $0x90] sm:$0xff]  ;;  %v189_v38 = vld [vmem:[#allocation8 + $0xa8] sm:$0xff]  ;;  %v191_v39 = vld [vmem:[#allocation8 + $0xb8] sm:$0xff] }
  0x40   :  { %v436_v40 = vpack.c.bf16 %v186_v37, %v184_v36  ;;  %v438_v41 = vpack.c.bf16 %v191_v39, %v189_v38  ;;  %v188_v42 = vld [vmem:[#allocation8 + $0xa0] sm:$0xff]  ;;  %v190_v43 = vld [vmem:[#allocation8 + $0xb0] sm:$0xff]  ;;  %v193_v44 = vld [vmem:[#allocation8 + $0xc8] sm:$0xff] }
  0x41   :  { %425 = vmatpush1.bf16.msra.mxu1 %v424_v22  ;;  %v195_v45 = vld [vmem:[#allocation8 + $0xd8] sm:$0xff]  ;;  %v440_v46 = vpack.c.bf16 %v190_v43, %v188_v42  ;;  %v192_v48 = vld [vmem:[#allocation8 + $0xc0] sm:$0xff]  ;;  %v194_v49 = vld [vmem:[#allocation8 + $0xd0] sm:$0xff] }
  0x42   :  { %427 = vmatprep.subr.bf16.mxu1 %v426_v23  ;;  %v442_v47 = vpack.c.bf16 %v195_v45, %v193_v44  ;;  %v197_v50 = vld [vmem:[#allocation8 + $0xe8] sm:$0xff]  ;;  %v199_v51 = vld [vmem:[#allocation8 + $0xf8] sm:$0xff]  ;;  %v444_v52 = vpack.c.bf16 %v194_v49, %v192_v48  ;;  %v196_v54 = vld [vmem:[#allocation8 + $0xe0] sm:$0xff] }
  0x43   :  { %v446_v53 = vpack.c.bf16 %v199_v51, %v197_v50  ;;  %v198_v55 = vld [vmem:[#allocation8 + $0xf0] sm:$0xff]  ;;  %v201_v56 = vld [vmem:[#allocation8 + $0x108] sm:$0xff]  ;;  %v203_v57 = vld [vmem:[#allocation8 + $0x118] sm:$0xff] }
  0x44   :  { %v448_v58 = vpack.c.bf16 %v198_v55, %v196_v54  ;;  %v450_v59 = vpack.c.bf16 %v203_v57, %v201_v56  ;;  %v200_v60 = vld [vmem:[#allocation8 + $0x100] sm:$0xff]  ;;  %v202_v61 = vld [vmem:[#allocation8 + $0x110] sm:$0xff]  ;;  %v205_v62 = vld [vmem:[#allocation8 + $0x128] sm:$0xff] }
  0x45   :  { %429 = vmatpush1.bf16.msra.mxu1 %v428_v28  ;;  %v207_v63 = vld [vmem:[#allocation8 + $0x138] sm:$0xff]  ;;  %v452_v0 = vpack.c.bf16 %v202_v61, %v200_v60  ;;  %v204_v2 = vld [vmem:[#allocation8 + $0x120] sm:$0xff]  ;;  %v206_v3 = vld [vmem:[#allocation8 + $0x130] sm:$0xff] }
  0x46   :  { %431 = vmatprep.subr.bf16.mxu1 %v430_v29  ;;  %v454_v1 = vpack.c.bf16 %v207_v63, %v205_v62  ;;  %v209_v4 = vld [vmem:[#allocation8 + $0x148] sm:$0xff]  ;;  %v211_v5 = vld [vmem:[#allocation8 + $0x158] sm:$0xff]  ;;  %v456_v6 = vpack.c.bf16 %v206_v3, %v204_v2  ;;  %v208_v8 = vld [vmem:[#allocation8 + $0x140] sm:$0xff] }
  0x47   :  { %v458_v7 = vpack.c.bf16 %v211_v5, %v209_v4  ;;  %v210_v9 = vld [vmem:[#allocation8 + $0x150] sm:$0xff]  ;;  %v213_v10 = vld [vmem:[#allocation8 + $0x168] sm:$0xff]  ;;  %v215_v11 = vld [vmem:[#allocation8 + $0x178] sm:$0xff] }
  0x48   :  { %v460_v12 = vpack.c.bf16 %v210_v9, %v208_v8  ;;  %v462_v13 = vpack.c.bf16 %v215_v11, %v213_v10  ;;  %v212_v14 = vld [vmem:[#allocation8 + $0x160] sm:$0xff]  ;;  %v214_v15 = vld [vmem:[#allocation8 + $0x170] sm:$0xff]  ;;  %v217_v16 = vld [vmem:[#allocation8 + $0x188] sm:$0xff] }
  0x49   :  { %433 = vmatpush1.bf16.msra.mxu1 %v432_v34  ;;  %v219_v17 = vld [vmem:[#allocation8 + $0x198] sm:$0xff]  ;;  %v464_v18 = vpack.c.bf16 %v214_v15, %v212_v14  ;;  %v216_v20 = vld [vmem:[#allocation8 + $0x180] sm:$0xff]  ;;  %v218_v21 = vld [vmem:[#allocation8 + $0x190] sm:$0xff] }
  0x4a   :  { %435 = vmatprep.subr.bf16.mxu1 %v434_v35  ;;  %v466_v19 = vpack.c.bf16 %v219_v17, %v217_v16  ;;  %v221_v22 = vld [vmem:[#allocation8 + $0x1a8] sm:$0xff]  ;;  %v223_v23 = vld [vmem:[#allocation8 + $0x1b8] sm:$0xff]  ;;  %v468_v24 = vpack.c.bf16 %v218_v21, %v216_v20  ;;  %v220_v26 = vld [vmem:[#allocation8 + $0x1a0] sm:$0xff] }
  0x4b   :  { %v470_v25 = vpack.c.bf16 %v223_v23, %v221_v22  ;;  %v222_v27 = vld [vmem:[#allocation8 + $0x1b0] sm:$0xff]  ;;  %v225_v28 = vld [vmem:[#allocation8 + $0x1c8] sm:$0xff]  ;;  %v227_v29 = vld [vmem:[#allocation8 + $0x1d8] sm:$0xff] }
  0x4c   :  { %v472_v30 = vpack.c.bf16 %v222_v27, %v220_v26  ;;  %v474_v31 = vpack.c.bf16 %v227_v29, %v225_v28  ;;  %v224_v32 = vld [vmem:[#allocation8 + $0x1c0] sm:$0xff]  ;;  %v226_v33 = vld [vmem:[#allocation8 + $0x1d0] sm:$0xff]  ;;  %v229_v35 = vld [vmem:[#allocation8 + $0x1e8] sm:$0xff] }
  0x4d   :  { %437 = vmatpush1.bf16.msra.mxu1 %v436_v40  ;;  %v476_v34 = vpack.c.bf16 %v226_v33, %v224_v32  ;;  %v231_v36 = vld [vmem:[#allocation8 + $0x1f8] sm:$0xff]  ;;  %v228_v38 = vld [vmem:[#allocation8 + $0x1e0] sm:$0xff]  ;;  %v230_v39 = vld [vmem:[#allocation8 + $0x1f0] sm:$0xff] }
  0x4e   :  { %439 = vmatprep.subr.bf16.mxu1 %v438_v41  ;;  %v478_v37 = vpack.c.bf16 %v231_v36, %v229_v35  ;;  %v480_v40 = vpack.c.bf16 %v230_v39, %v228_v38  ;;  %v74_v41 = vlaneseq  ;;  %v72_v44 = vld [vmem:[%s711_s2] sm:$0x3]  ;;  %v318_v54 = vld [vmem:[%s714_s5 + $0x8] sm:$0xff] }
  0x4f   :  { %385 = vmatprep.mubr.f32.mxu0 %v318_v54  ;;  %v232_v55 = vld [vmem:[%s713_s4] sm:$0x3]  ;;  %s591_s4 = smov [#allocation9]  }
  0x50   :  { %v75_v42 = vshrl.u32 %v74_v41, 7  ;;  %s399_s22 = sshll.u32 %s591_s4, 4  ;;  %s400_s22 = int_to_ptr.vmem [resolvable:$true] %s399_s22 }
  0x51   :  { %441 = vmatpush1.bf16.msra.mxu1 %v440_v46  ;;  %s556_s23 = scalar_lea.vmem %s400_s22, 128  ;;  %p561_p11 = scmp.lt.s32.totalorder %s400_s22, %s400_s22 }
  0x52   :  { %443 = vmatprep.subr.bf16.mxu1 %v442_v47  ;;  %v76_v43 = vsub.s32 0, %v75_v42  ;;  %v80_v45 = vsub.s32 1, %v75_v42  ;;  %p557_p10 = scmp.ne.s32.totalorder %s400_s22, %s556_s23  ;;  %p562_p12 = scmp.lt.s32.totalorder %s556_s23, %s556_s23 }
  0x54   :  { %v77_v46 = vrot.slane %v72_v44, %v76_v43  ;;  %v81_v47 = vrot.slane %v72_v44, %v80_v45  ;;  %v237_v56 = vrot.slane %v232_v55, %v76_v43  ;;  %v241_v57 = vrot.slane %v232_v55, %v80_v45  ;;  %p563_p13 = por %p562_p12, %p561_p11 }
  0x55   :  { %445 = vmatpush1.bf16.msra.mxu1 %v444_v52 }
  0x56   :  { %447 = vmatprep.subr.bf16.mxu1 %v446_v53  ;;  %p564_p0 = pnand %p563_p13, %p557_p10 }
  0x59   :  { %449 = vmatpush1.bf16.msra.mxu1 %v448_v58 }
  0x5a   :  { %451 = vmatprep.subr.bf16.mxu1 %v450_v59 }
  0x5d   :  { %453 = vmatpush1.bf16.msra.mxu1 %v452_v0  ;;  %v317_v0 = vld [vmem:[%s714_s5] sm:$0xff] }
  0x5e   :  { %455 = vmatprep.subr.bf16.mxu1 %v454_v1  ;;  %v320_v1 = vstv %s715_s6 }
  0x61   :  { %457 = vmatpush1.bf16.msra.mxu1 %v456_v6 }
  0x62   :  { %459 = vmatprep.subr.bf16.mxu1 %v458_v7 }
  0x65   :  { %461 = vmatpush1.bf16.msra.mxu1 %v460_v12 }
  0x66   :  { %463 = vmatprep.subr.bf16.mxu1 %v462_v13 }
  0x69   :  { %465 = vmatpush1.bf16.msra.mxu1 %v464_v18 }
  0x6a   :  { %467 = vmatprep.subr.bf16.mxu1 %v466_v19 }
  0x6d   :  { %469 = vmatpush1.bf16.msra.mxu1 %v468_v24 }
  0x6e   :  { %471 = vmatprep.subr.bf16.mxu1 %v470_v25 }
  0x71   :  { %473 = vmatpush1.bf16.msra.mxu1 %v472_v30 }
  0x72   :  { %475 = vmatprep.subr.bf16.mxu1 %v474_v31 }
  0x75   :  { %477 = vmatpush1.bf16.msra.mxu1 %v476_v34 }
  0x76   :  { %479 = vmatprep.subr.bf16.mxu1 %v478_v37 }
  0x79   :  { %481 = vmatpush1.bf16.msra.mxu1 %v480_v40 }
 0x111   :  { %v161_v48 = vpop.f32.mrb[0].mxu0 }
 0x112   :  { %v162_v49 = vadd.f32 %v161_v48, %v77_v46  ;;  %v163_v50 = vpop.f32.mrb[1].mxu0 }
 0x113   :  { %v164_v51 = vadd.f32 %v163_v50, %v81_v47 }
 0x114   :  { %v166_v53 = vmax.f32 %v162_v49, 0.0 }
 0x115   :  { %v167_v52 = vmax.f32 %v164_v51, 0.0 }
 0x117   :  { %308 = vmatprep.mubr.f32.mxu1 %v167_v52 }
 0x118   :  { %309 = vmatmul.mubr.f32.vlgmr.msra.gmra.mrb[0].mxu1 %v166_v53 }
 0x1eb   :  { %v310_v58 = vpop.f32.mrb[0].mxu1 }
 0x1ec   :  { %v311_v59 = vadd.f32 %v310_v58, %v237_v56  ;;  %v312_v60 = vpop.f32.mrb[1].mxu1 }
 0x1ed   :  { %v313_v61 = vadd.f32 %v312_v60, %v241_v57 }
 0x1ee   :  { %v315_v63 = vmax.f32 %v311_v59, 0.0 }
 0x1ef   :  { %v316_v62 = vmax.f32 %v313_v61, 0.0 }
 0x1f1   :  { %321 = vmatprep.subr.mxu0 %v316_v62 }
 0x1f2   :  { %322 = vmatpush1.xpose.msra.mxu0 %v315_v63 }
 0x1f5   :  { %386 = vmatmul.mubr.f32.vlgmr.msra.gmra.mrb[2].mxu0 %v317_v0 }
 0x2c8   :  { %v387_v2 = vpop.f32.mrb[2].mxu0 }
 0x2c9   :  { %v388_v3 = vadd.f32 %v387_v2, %v320_v1  ;;  %v389_v4 = vpop.f32.mrb[3].mxu0 }
 0x2cb   :  { %392 = vst.msk [vmem:[#allocation9] sm:$0xff] %vm391_vm4, %v388_v3 }
 0x2cc   :  { %567 = shalt.err (!%p564_p0)
}
 0x2cd   :  { %s568_s26 = scalar_lea.hbm %s716_s7, 128 }
 0x2ce   :  { %p569_p1 = scmp.ne.s32.totalorder %s716_s7, %s568_s26  ;;  %p572_p2 = scmp.lt.u32.totalorder %s568_s26, %s716_s7 }
 0x2d0   :  { %p574_p3 = pnand %p572_p2, %p569_p1 }
 0x2d2   :  { %577 = shalt.err (!%p574_p3)
}
 0x2d3   :  { %402 = dma.vmem_to_hbm [thread:$0]  %s400_s22, 128, %s716_s7, [#allocation5]  }
 0x2d4   :  { %582 = dma.done.wait [#allocation5], 128  }
 0x2d5   :  { %583 = vsyncadd [#allocation5], 4294967168 }
 0x2d6   :  { %406 = vsyncpa [#allocation4], 1 }
 0x2d7   :  { %407 = vsyncpa [#allocation7], 1 }
 0x2d8   :  { %408 = vsyncpa [#allocation5], 1 }

</bundles_post_ra>
